<compile_context>
chip_gen: v7x
topology: tpu7x:2x2x1
jax: 0.10.0
libtpu: 0.0.40
codegen_flags: <defaults>
</compile_context>

<pallas_src>
import jax
import jax.numpy as jnp
from jax.experimental import pallas as pl
from jax.experimental.pallas import tpu as pltpu


def _round_up(x: int, m: int) -> int:
    return ((x + m - 1) // m) * m


def _table_embed_kernel(idx_ref, fused_ref, bias_ref, out_ref):
    tn = out_ref.shape[0]          # rows (tokens) in this tile
    nt = fused_ref.shape[0]        # padded number of tables

    # In-register one-hot from the int32 index tile ([TN, 1] broadcast over lanes).
    table_ids = jax.lax.broadcasted_iota(jnp.int32, (tn, nt), 1)
    onehot = (table_ids == idx_ref[...]).astype(fused_ref.dtype)

    # Gather-as-matmul on the MXU against the fused (table @ W) matrix, f32 acc.
    y = jnp.dot(onehot, fused_ref[...], preferred_element_type=jnp.float32)

    # f32 epilogue on the VPU: bias (resident [1, D_pad]) + LeakyReLU (slope 0.01).
    y = y + bias_ref[...]
    out_ref[...] = jnp.maximum(y, 0.01 * y)


def table_embed(feature, table, weight, bias, *, tile_n: int = 512):
    """feature: int32 [B, S]; table: [n_tables, E]; weight: [E, D]; bias: [D].

    Returns float32 [B, S, D] == leaky_relu(Embedding(feature) @ W + b).
    Note: out-of-range feature ids yield a zero embedding row (bias-only
    output) rather than raising like torch.nn.Embedding.
    """
    B, S = feature.shape
    n_tables, E = table.shape
    D = weight.shape[1]
    N = B * S

    # Algebraic fusion: fold the Linear weight into the embedding table.
    fused = table.astype(jnp.float32) @ weight.astype(jnp.float32)    # [n_tables, D]

    # Pad to lane/MXU-friendly sizes; clamp the token tile for tiny inputs.
    nt_pad = _round_up(n_tables, 128)
    d_pad = _round_up(D, 128)
    tile_n = max(8, min(tile_n, _round_up(N, 8)))
    num_tiles = pl.cdiv(N, tile_n)
    n_pad = num_tiles * tile_n

    fused_p = (jnp.zeros((nt_pad, d_pad), jnp.float32)
               .at[:n_tables, :D].set(fused)
               .astype(jnp.bfloat16))                                  # resident, bf16
    bias_p = (jnp.zeros((1, d_pad), jnp.float32)
              .at[0, :D].set(bias.astype(jnp.float32)))                # resident, f32

    idx = feature.reshape(N).astype(jnp.int32)
    idx_p = jnp.full((n_pad, 1), -1, jnp.int32).at[:N, 0].set(idx)     # tiled over N

    out = pl.pallas_call(
        _table_embed_kernel,
        out_shape=jax.ShapeDtypeStruct((n_pad, d_pad), jnp.float32),
        grid=(num_tiles,),
        in_specs=[
            pl.BlockSpec((tile_n, 1), lambda i: (i, 0)),       # indices: N-tiled
            pl.BlockSpec((nt_pad, d_pad), lambda i: (0, 0)),   # fused table: resident
            pl.BlockSpec((1, d_pad), lambda i: (0, 0)),        # bias: resident
        ],
        out_specs=pl.BlockSpec((tile_n, d_pad), lambda i: (i, 0)),
        compiler_params=pltpu.CompilerParams(
            dimension_semantics=("parallel",),
            # Conservative explicit budget: resident fused table (<=64 KiB at
            # these shapes) + double-buffered idx/out tiles fit with headroom
            # even on v7x's 64 MiB VMEM.
            vmem_limit_bytes=32 * 1024 * 1024,
        ),
    )(idx_p, fused_p, bias_p)

    return out[:N, :D].reshape(B, S, D)


if __name__ == "__main__":
    embed_size, output_dim, n_tables = 32, 32, 32
    B, S = 2, 8  # batch of 2 sequences of 8 table ids

    key = jax.random.PRNGKey(0)
    k_tab, k_w, k_b, k_feat = jax.random.split(key, 4)

    # Deterministic parameter init (mirrors nn.Embedding ~ N(0,1),
    # nn.Linear ~ U(-1/sqrt(in), 1/sqrt(in))).
    table = jax.random.normal(k_tab, (n_tables, embed_size), dtype=jnp.float32)
    bound = 1.0 / (embed_size ** 0.5)
    weight = jax.random.uniform(k_w, (embed_size, output_dim),
                                minval=-bound, maxval=bound, dtype=jnp.float32)
    bias = jax.random.uniform(k_b, (output_dim,),
                              minval=-bound, maxval=bound, dtype=jnp.float32)

    feature = jax.random.randint(k_feat, (B, S), 0, n_tables, dtype=jnp.int32)

    out = jax.block_until_ready(table_embed(feature, table, weight, bias))
    assert out.shape == (B, S, output_dim)

    # Tight check against the same fused bf16 algebra the kernel uses.
    fused_bf16 = (table @ weight).astype(jnp.bfloat16).astype(jnp.float32)
    ref_bf16 = jnp.take(fused_bf16, feature, axis=0) + bias
    ref_bf16 = jnp.maximum(ref_bf16, 0.01 * ref_bf16)
    assert jnp.allclose(out, ref_bf16, atol=1e-5, rtol=1e-5)

    # Looser check against the full-f32 PyTorch semantics (bf16 table roundoff).
    ref_f32 = jnp.take(table, feature, axis=0) @ weight + bias
    ref_f32 = jnp.maximum(ref_f32, 0.01 * ref_f32)
    assert jnp.allclose(out, ref_f32, atol=3e-2, rtol=3e-2)

    print("KERNEL_OK")
</pallas_src>

<mosaic_0001>
module attributes {stable_mosaic.version = 11 : i64} {
  func.func @_table_embed_kernel(%arg0: i32, %arg1: memref<16x1xi32, #tpu.memory_space<vmem>>, %arg2: memref<128x128xbf16, #tpu.memory_space<vmem>>, %arg3: memref<1x128xf32, #tpu.memory_space<vmem>>, %arg4: memref<16x128xf32, #tpu.memory_space<vmem>>) attributes {dimension_semantics = [#tpu.dimension_semantics<parallel>], iteration_bounds = array<i64: 1>, scalar_prefetch = 0 : i64, scratch_operands = 0 : i64, tpu.core_type = #tpu.core_type<tc>, window_params = [{transform_indices = @transform_0, window_bounds = array<i64: 16, 1>}, {pipeline_mode = #tpu.pipeline_mode<synchronous>, transform_indices = @transform_1, window_bounds = array<i64: 128, 128>}, {pipeline_mode = #tpu.pipeline_mode<synchronous>, transform_indices = @transform_2, window_bounds = array<i64: 1, 128>}, {transform_indices = @transform_3, window_bounds = array<i64: 16, 128>}]} {
    %0 = tpu.iota {dimensions = array<i32: 1>} : vector<16x128xi32>
    %c0 = arith.constant 0 : index
    %c0_0 = arith.constant 0 : index
    %1 = vector.load %arg1[%c0, %c0_0] : memref<16x1xi32, #tpu.memory_space<vmem>>, vector<16x1xi32>
    %2 = vector.broadcast %1 : vector<16x1xi32> to vector<16x128xi32>
    %3 = arith.cmpi eq, %0, %2 : vector<16x128xi32>
    %4 = arith.extui %3 : vector<16x128xi1> to vector<16x128xi32>
    %5 = arith.sitofp %4 : vector<16x128xi32> to vector<16x128xf32>
    %6 = arith.truncf %5 : vector<16x128xf32> to vector<16x128xbf16>
    %c0_1 = arith.constant 0 : index
    %c0_2 = arith.constant 0 : index
    %7 = vector.load %arg2[%c0_1, %c0_2] : memref<128x128xbf16, #tpu.memory_space<vmem>>, vector<128x128xbf16>
    %cst = arith.constant dense<0.000000e+00> : vector<16x128xf32>
    %8 = tpu.matmul %6, %7, %cst {dimension_numbers = #tpu.dot_dimension_numbers<[1], [0], [0], [1], [0, 0, 1, 1], [], []>} : vector<16x128xbf16>, vector<128x128xbf16>, vector<16x128xf32> -> vector<16x128xf32>
    %c0_3 = arith.constant 0 : index
    %c0_4 = arith.constant 0 : index
    %9 = vector.load %arg3[%c0_3, %c0_4] : memref<1x128xf32, #tpu.memory_space<vmem>>, vector<1x128xf32>
    %10 = vector.broadcast %9 : vector<1x128xf32> to vector<16x128xf32>
    %11 = arith.addf %8, %10 : vector<16x128xf32>
    %cst_5 = arith.constant 0.00999999977 : f32
    %12 = vector.broadcast %cst_5 : f32 to vector<16x128xf32>
    %13 = arith.mulf %12, %11 : vector<16x128xf32>
    %14 = arith.maximumf %11, %13 : vector<16x128xf32>
    %c0_6 = arith.constant 0 : index
    %c0_7 = arith.constant 0 : index
    %15 = vector.load %arg4[%c0_6, %c0_7] : memref<16x128xf32, #tpu.memory_space<vmem>>, vector<16x128xf32>
    tpu.vector_store %arg4[%c0_6, %c0_7], %14 {strides = array<i32>} : memref<16x128xf32, #tpu.memory_space<vmem>>, vector<16x128xf32>,
    return
  }
  func.func @transform_0(%arg0: i32) -> (i32, i32) {
    %c0_i32 = arith.constant 0 : i32
    %c0_i32_0 = arith.constant 0 : i32
    return %arg0, %c0_i32 : i32, i32
  }
  func.func @transform_1(%arg0: i32) -> (i32, i32) {
    %c0_i32 = arith.constant 0 : i32
    %c0_i32_0 = arith.constant 0 : i32
    %c0_i32_1 = arith.constant 0 : i32
    return %c0_i32, %c0_i32_0 : i32, i32
  }
  func.func @transform_2(%arg0: i32) -> (i32, i32) {
    %c0_i32 = arith.constant 0 : i32
    %c0_i32_0 = arith.constant 0 : i32
    %c0_i32_1 = arith.constant 0 : i32
    return %c0_i32, %c0_i32_0 : i32, i32
  }
  func.func @transform_3(%arg0: i32) -> (i32, i32) {
    %c0_i32 = arith.constant 0 : i32
    %c0_i32_0 = arith.constant 0 : i32
    return %arg0, %c0_i32 : i32, i32
  }
}

</mosaic_0001>

<bundles_post_ra>
// kernel: tpu_custom_call.1
= control target key start
LH: loop header
LB: loop body
LE: loop exit
PB: predicated region body
PF: predicated region fallthrough
CT: control target
= control target key end

     0   :  { %8 = vsyncpa [#allocation3], 0  ;;  %s354_s0 = inlined_call_operand.vmem [shape: s32[16,1], index: 0, kind: input, shape index: {}]   ;;  %s355_s1 = inlined_call_operand.hbm [shape: bf16[128,128], index: 1, kind: input, shape index: {}]   ;;  %s356_s2 = inlined_call_operand.vmem [shape: f32[1,128], index: 2, kind: input, shape index: {}]   ;;  %s357_s3 = inlined_call_operand.hbm [shape: f32[16,128], index: 3, kind: output, shape index: {}]  }
   0x1   :  { %9 = vsyncpa [#allocation4], 0  ;;  %s291_s12 = smov [#allocation2]   ;;  %s243_s16 = scalar_lea.hbm %s355_s1, 1024 }
   0x2   :  { %s17_s13 = sshll.u32 %s291_s12, 4  ;;  %p244_p0 = scmp.ne.s32.totalorder %s355_s1, %s243_s16  ;;  %s18_s13 = int_to_ptr.vmem [resolvable:$true] %s17_s13 }
   0x3   :  { %p247_p1 = scmp.lt.u32.totalorder %s243_s16, %s355_s1 }
   0x5   :  { %p249_p2 = pnand %p247_p1, %p244_p0 }
   0x7   :  { %252 = shalt.err (!%p249_p2)
}
   0x8   :  { %s253_s21 = scalar_lea.vmem %s18_s13, 1024  ;;  %p258_p4 = scmp.lt.s32.totalorder %s18_s13, %s18_s13 }
   0x9   :  { %p254_p3 = scmp.ne.s32.totalorder %s18_s13, %s253_s21  ;;  %p259_p5 = scmp.lt.s32.totalorder %s253_s21, %s253_s21 }
   0xb   :  { %p260_p6 = por %p259_p5, %p258_p4 }
   0xd   :  { %p261_p7 = pnand %p260_p6, %p254_p3 }
   0xf   :  { %264 = shalt.err (!%p261_p7)
}
  0x10   :  { %s292_s22 = smov 64   ;;  %s293_s23 = smov 4  }
  0x11   :  { %23 = dma.hbm_to_vmem [thread:$0]  %s355_s1, 1024, %s18_s13, [#allocation3], %s292_s22, %s292_s22, %s293_s23  }
  0x12   :  { %287 = dma.done.wait [#allocation3], 1024  }
  0x13   :  { %288 = vsyncadd [#allocation3], 4294966272  ;;  %v294_v0 = vmov 0   ;;  %v295_v1 = vmov 0.0   ;;  %v32_v2 = vld [vmem:[%s354_s0] sm:$0xff]  ;;  %v235_v3 = vld [vmem:[#allocation2] sm:$0xff]   ;;  %v30_v12 = vlaneseq }
  0x14   :  { %234 = vset.pattern.permute.xlu0 %v294_v0  ;;  %204 = vmatprep.subr.bf16.mxu0 %v295_v1  ;;  %v33_v4 = vld [vmem:[%s354_s0 + $0x8] sm:$0xff]  ;;  %v236_v5 = vld [vmem:[#allocation2 + $0x8] sm:$0xff]   ;;  %vm296_vm0 = vmmov 0   ;;  %v238_v7 = vld [vmem:[#allocation2 + $0x18] sm:$0xff]   ;;  %v297_v16 = vmov 1.0|1.0  }
  0x15   :  { %35 = vperm.xlu0 %234, %v32_v2   ;;  %205 = vmatpush3.bf16.msra.mxu0 %v235_v3  ;;  %v237_v6 = vld [vmem:[#allocation2 + $0x10] sm:$0xff]   ;;  %v239_v8 = vld [vmem:[#allocation2 + $0x20] sm:$0xff]   ;;  %v240_v9 = vld [vmem:[#allocation2 + $0x28] sm:$0xff]   ;;  %v31_v14 = vand.u32 127, %v30_v12  ;;  %s298_s30 = smov [#allocation5]  }
  0x16   :  { %206 = vmatprep.subr.bf16.mxu0 %v295_v1  ;;  %220 = vmatprep.mubr.msk.bf16.mxu0 %vm296_vm0, %v295_v1  ;;  %v241_v10 = vld [vmem:[#allocation2 + $0x30] sm:$0xff]   ;;  %v242_v11 = vld [vmem:[#allocation2 + $0x38] sm:$0xff]   ;;  %v184_v17 = vld [vmem:[%s356_s2] ss:$0 sm:$0xff]  ;;  %s170_s4 = sshll.u32 %s298_s30, 4  ;;  %s171_s4 = int_to_ptr.vmem [resolvable:$true] %s170_s4 }
  0x17   :  { %s265_s5 = scalar_lea.vmem %s171_s4, 256  ;;  %p270_p9 = scmp.lt.s32.totalorder %s171_s4, %s171_s4 }
  0x18   :  { %p266_p8 = scmp.ne.s32.totalorder %s171_s4, %s265_s5  ;;  %p271_p10 = scmp.lt.s32.totalorder %s265_s5, %s265_s5 }
  0x19   :  { %38 = vperm.xlu0 %234, %v33_v4   ;;  %207 = vmatpush3.bf16.msra.mxu0 %v236_v5 }
  0x1a   :  { %208 = vmatprep.subr.bf16.mxu0 %v295_v1  ;;  %p272_p11 = por %p271_p10, %p270_p9 }
  0x1c   :  { %p273_p12 = pnand %p272_p11, %p266_p8 }
  0x1d   :  { %209 = vmatpush3.bf16.msra.mxu0 %v237_v6 }
  0x1e   :  { %210 = vmatprep.subr.bf16.mxu0 %v295_v1 }
  0x21   :  { %211 = vmatpush3.bf16.msra.mxu0 %v238_v7 }
  0x22   :  { %212 = vmatprep.subr.bf16.mxu0 %v295_v1 }
  0x25   :  { %213 = vmatpush3.bf16.msra.mxu0 %v239_v8 }
  0x26   :  { %214 = vmatprep.subr.bf16.mxu0 %v295_v1 }
  0x29   :  { %215 = vmatpush3.bf16.msra.mxu0 %v240_v9 }
  0x2a   :  { %216 = vmatprep.subr.bf16.mxu0 %v295_v1 }
  0x2d   :  { %217 = vmatpush3.bf16.msra.mxu0 %v241_v10 }
  0x2e   :  { %218 = vmatprep.subr.bf16.mxu0 %v295_v1 }
  0x31   :  { %219 = vmatpush3.bf16.msra.mxu0 %v242_v11 }
  0x94   :  { %v36_v13 = vpop.permute.xlu0 %35 }
  0x95   :  { %vm40_vm1 = vcmp.eq.s32.totalorder %v31_v14, %v36_v13 }
  0x98   :  { %v39_v15 = vpop.permute.xlu0 %38 }
  0x99   :  { %vm41_vm2 = vcmp.eq.s32.totalorder %v31_v14, %v39_v15 }
  0x9a   :  { %vm193_vm3 = vmpackc.low %vm41_vm2, %vm40_vm1 }
  0x9b   :  { %221 = vmatmul.mubr.msk.bf16.vlgmr.msra.gmra.mrb[0].mxu0 %vm193_vm3, %v297_v16 }
 0x16e   :  { %v152_v18 = vpop.f32.mrb[0].mxu0 }
 0x16f   :  { %v153_v19 = vadd.f32 %v184_v17, %v152_v18  ;;  %v222_v20 = vpop.f32.mrb[1].mxu0 }
 0x170   :  { %v155_v21 = vpop.f32.mrb[2].mxu0 }
 0x171   :  { %v159_v22 = vmul.f32 0.01, %v153_v19  ;;  %v156_v23 = vadd.f32 %v184_v17, %v155_v21  ;;  %v223_v24 = vpop.f32.mrb[3].mxu0 }
 0x173   :  { %v161_v25 = vmax.f32 %v153_v19, %v159_v22  ;;  %v160_v26 = vmul.f32 0.01, %v156_v23 }
 0x175   :  { %163 = vst [vmem:[#allocation5] sm:$0xff] %v161_v25  ;;  %v162_v27 = vmax.f32 %v156_v23, %v160_v26 }
 0x177   :  { %164 = vst [vmem:[#allocation5 + $0x8] sm:$0xff] %v162_v27 }
 0x178   :  { %276 = shalt.err (!%p273_p12)
}
 0x179   :  { %s277_s7 = scalar_lea.hbm %s357_s3, 256 }
 0x17a   :  { %p278_p13 = scmp.ne.s32.totalorder %s357_s3, %s277_s7  ;;  %p281_p0 = scmp.lt.u32.totalorder %s277_s7, %s357_s3 }
 0x17c   :  { %p283_p1 = pnand %p281_p0, %p278_p13 }
 0x17e   :  { %286 = shalt.err (!%p283_p1)
}
 0x17f   :  { %s299_s12 = smov 128   ;;  %s300_s13 = smov 8  }
 0x180   :  { %176 = dma.vmem_to_hbm [thread:$0]  %s171_s4, 256, %s357_s3, [#allocation4], %s299_s12, %s299_s12, %s300_s13  }
 0x181   :  { %289 = dma.done.wait [#allocation4], 256  }
 0x182   :  { %290 = vsyncadd [#allocation4], 4294967040 }
 0x183   :  { %180 = vsyncpa [#allocation3], 1 }
 0x184   :  { %181 = vsyncpa [#allocation4], 1 }

</bundles_post_ra>
